<compile_context>
chip_gen: v7x
topology: tpu7x:2x2x1
jax: 0.10.0
libtpu: 0.0.40
codegen_flags: <defaults>
</compile_context>

<pallas_src>
import functools

import jax
import jax.numpy as jnp
from jax.experimental import pallas as pl
from jax.experimental.pallas import tpu as pltpu

_LANE_PAD = 128  # lane-aligned zero halo around the flattened spatial axis


def _round_up(x, m):
    return (x + m - 1) // m * m


# ---------------------------------------------------------------------------
# Kernel 1: BatchNorm2d batch statistics folded into per-channel scale/shift.
# Grid: (N,) reduction ("arbitrary"); accumulators live in VMEM scratch.
# ---------------------------------------------------------------------------
def _bn_stats_kernel(x_ref, gamma_ref, beta_ref, scale_ref, shift_ref,
                     sum_ref, sq_ref, *, count, eps):
    n = pl.program_id(0)

    @pl.when(n == 0)
    def _init():
        sum_ref[...] = jnp.zeros_like(sum_ref)
        sq_ref[...] = jnp.zeros_like(sq_ref)

    x = x_ref[0]                                          # (Cin_p, HW) f32
    sum_ref[...] += jnp.sum(x, axis=1, keepdims=True)     # lane (XLU) reduce
    sq_ref[...] += jnp.sum(x * x, axis=1, keepdims=True)

    @pl.when(n == pl.num_programs(0) - 1)
    def _finalize():
        inv_count = 1.0 / count
        mean = sum_ref[...] * inv_count
        var = sq_ref[...] * inv_count - mean * mean        # biased variance
        scale = gamma_ref[...] * jax.lax.rsqrt(var + eps)  # EUP rsqrt
        scale_ref[...] = scale
        shift_ref[...] = beta_ref[...] - mean * scale


# ---------------------------------------------------------------------------
# Kernel 2: y = Conv3x3(ReLU(x*scale + shift)) + bias  as one lane-dense GEMM.
# Grid: (N,) "parallel" (one image per step; pipelined / megacore-sharded).
# ---------------------------------------------------------------------------
def _bn_relu_conv_kernel(x_ref, scale_ref, shift_ref, w_ref, b_ref, o_ref,
                         pad_ref, col_ref, *, H, W, HW, Cin_p, Cout):
    # ---- folded BN + ReLU (elementwise math stays f32; bf16 only at the MXU)
    x = x_ref[0]                                           # (Cin_p, HW)
    a = jnp.maximum(x * scale_ref[...] + shift_ref[...], 0.0)

    # ---- zero-haloed flat activation buffer: zero only the halo, write the
    #      interior once (no full double write of a padded buffer).
    pad_ref[:, :_LANE_PAD] = jnp.zeros((Cin_p, _LANE_PAD), jnp.float32)
    pad_ref[:, _LANE_PAD + HW:] = jnp.zeros((Cin_p, _LANE_PAD), jnp.float32)
    pad_ref[:, _LANE_PAD:_LANE_PAD + HW] = a

    # Column masks for the left/right taps (row wrap-around of the flat axis).
    w_idx = jax.lax.broadcasted_iota(jnp.int32, (1, HW), 1) % W
    not_left = w_idx != 0
    not_right = w_idx != (W - 1)

    # ---- im2col: 9 shifted lane-views stacked along sublanes -> (9*Cin_p, HW)
    for kh in range(3):
        for kw in range(3):
            start = _LANE_PAD + (kh - 1) * W + (kw - 1)
            piece = pad_ref[:, start:start + HW]           # (Cin_p, HW)
            if kw == 0:
                piece = jnp.where(not_left, piece, 0.0)
            elif kw == 2:
                piece = jnp.where(not_right, piece, 0.0)
            tap = kh * 3 + kw
            col_ref[tap * Cin_p:(tap + 1) * Cin_p, :] = piece

    # ---- single MXU GEMM: bf16 inputs, f32 accumulation, lane-dense output.
    acc = jnp.dot(w_ref[...], col_ref[...].astype(jnp.bfloat16),
                  preferred_element_type=jnp.float32)      # (Cout, HW)
    o_ref[0] = acc + b_ref[...]


def conv_block_pallas(x_flat, gamma, beta, w_hwio, bias, *, H, W, eps=1e-5):
    """One conv_block on a (N, Cin, H*W) f32 input; returns (N, Cout, H*W) f32."""
    N, Cin, HW = x_flat.shape
    Cout = w_hwio.shape[-1]
    Cin_p = _round_up(Cin, 8)                 # sublane-align the channel axis
    pad_c = Cin_p - Cin

    xp = jnp.pad(x_flat, ((0, 0), (0, pad_c), (0, 0))).astype(jnp.float32)
    gp = jnp.pad(gamma.astype(jnp.float32), (0, pad_c)).reshape(Cin_p, 1)
    bp = jnp.pad(beta.astype(jnp.float32), (0, pad_c)).reshape(Cin_p, 1)
    # (3,3,Cin,Cout) -> (Cout, 9*Cin_p), tap-major rows, bf16 for the MXU.
    wp = jnp.pad(w_hwio.astype(jnp.float32),
                 ((0, 0), (0, 0), (0, pad_c), (0, 0)))
    wp = wp.reshape(9 * Cin_p, Cout).T.astype(jnp.bfloat16)
    bb = bias.astype(jnp.float32).reshape(Cout, 1)

    # ---- 1) BN batch stats -> per-channel scale/shift -----------------------
    scale, shift = pl.pallas_call(
        functools.partial(_bn_stats_kernel, count=N * HW, eps=eps),
        grid=(N,),
        in_specs=[
            pl.BlockSpec((1, Cin_p, HW), lambda n: (n, 0, 0)),
            pl.BlockSpec((Cin_p, 1), lambda n: (0, 0)),
            pl.BlockSpec((Cin_p, 1), lambda n: (0, 0)),
        ],
        out_specs=[
            pl.BlockSpec((Cin_p, 1), lambda n: (0, 0)),
            pl.BlockSpec((Cin_p, 1), lambda n: (0, 0)),
        ],
        out_shape=[jax.ShapeDtypeStruct((Cin_p, 1), jnp.float32)] * 2,
        scratch_shapes=[pltpu.VMEM((Cin_p, 1), jnp.float32)] * 2,
        compiler_params=pltpu.CompilerParams(
            dimension_semantics=("arbitrary",)),
    )(xp, gp, bp)

    # ---- 2) fused scale/shift + ReLU + 3x3 conv as one GEMM -----------------
    flops = 2 * N * HW * 9 * Cin_p * Cout + 3 * N * Cin_p * HW
    bytes_accessed = (xp.size * 4 + wp.size * 2 + 2 * Cin_p * 4
                      + Cout * 4 + N * Cout * HW * 4)
    y = pl.pallas_call(
        functools.partial(_bn_relu_conv_kernel,
                          H=H, W=W, HW=HW, Cin_p=Cin_p, Cout=Cout),
        grid=(N,),
        in_specs=[
            pl.BlockSpec((1, Cin_p, HW), lambda n: (n, 0, 0)),
            pl.BlockSpec((Cin_p, 1), lambda n: (0, 0)),
            pl.BlockSpec((Cin_p, 1), lambda n: (0, 0)),
            pl.BlockSpec((Cout, 9 * Cin_p), lambda n: (0, 0)),
            pl.BlockSpec((Cout, 1), lambda n: (0, 0)),
        ],
        out_specs=pl.BlockSpec((1, Cout, HW), lambda n: (n, 0, 0)),
        out_shape=jax.ShapeDtypeStruct((N, Cout, HW), jnp.float32),
        scratch_shapes=[
            pltpu.VMEM((Cin_p, HW + 2 * _LANE_PAD), jnp.float32),  # haloed act
            pltpu.VMEM((9 * Cin_p, HW), jnp.float32),              # im2col
        ],
        compiler_params=pltpu.CompilerParams(
            dimension_semantics=("parallel",),
            vmem_limit_bytes=32 * 1024 * 1024),
        cost_estimate=pl.CostEstimate(flops=flops, transcendentals=0,
                                      bytes_accessed=bytes_accessed),
    )(xp, scale, shift, wp, bb)
    return y


def dense_block_pallas(x_nchw, params):
    """DenseBlock forward (NCHW in / NCHW out). params: [(gamma, beta, w_hwio, bias)]."""
    N, C, H, W = x_nchw.shape
    x = x_nchw.reshape(N, C, H * W)          # spatial onto the 128-lane axis (free)
    for (gamma, beta, w, b) in params:
        y = conv_block_pallas(x, gamma, beta, w, b, H=H, W=W)
        # TODO(synk): replace this O(L^2) concat with a preallocated
        # (N, C_total, H*W) buffer written in place via input_output_aliases /
        # channel-offset out_specs.
        x = jnp.concatenate([x, y], axis=1)
    return x.reshape(N, x.shape[1], H, W)


def dense_block_reference(x_nchw, params, eps=1e-5):
    """Pure-JAX f32 reference of the PyTorch forward (NCHW), for validation."""
    X = x_nchw
    for (gamma, beta, w_hwio, bias) in params:
        mean = jnp.mean(X, axis=(0, 2, 3), keepdims=True)
        var = jnp.mean((X - mean) ** 2, axis=(0, 2, 3), keepdims=True)
        a = (X - mean) / jnp.sqrt(var + eps)
        a = a * gamma.reshape(1, -1, 1, 1) + beta.reshape(1, -1, 1, 1)
        a = jnp.maximum(a, 0.0)
        y = jax.lax.conv_general_dilated(
            a, w_hwio, window_strides=(1, 1), padding="SAME",
            dimension_numbers=("NCHW", "HWIO", "NCHW"))
        y = y + bias.reshape(1, -1, 1, 1)
        X = jnp.concatenate([X, y], axis=1)
    return X


def make_params(key, num_conv, num_channels, in_channels):
    """Deterministic parameter init (shapes follow the PyTorch module)."""
    params = []
    cin = in_channels
    for _ in range(num_conv):
        key, kw, kb = jax.random.split(key, 3)
        gamma = jnp.ones((cin,), jnp.float32)                 # BN weight init
        beta = jnp.zeros((cin,), jnp.float32)                 # BN bias init
        w = 0.1 * jax.random.normal(kw, (3, 3, cin, num_channels), jnp.float32)
        b = 0.1 * jax.random.normal(kb, (num_channels,), jnp.float32)
        params.append((gamma, beta, w, b))
        cin += num_channels                                   # dense growth
    return params


if __name__ == "__main__":
    key = jax.random.PRNGKey(0)
    k_x, k_p = jax.random.split(key)

    N, C, H, W = 2, 4, 16, 16
    num_conv, num_channels = 2, 8

    x = jax.random.normal(k_x, (N, C, H, W), jnp.float32)
    params = make_params(k_p, num_conv, num_channels, C)

    out = jax.block_until_ready(dense_block_pallas(x, params))
    ref = dense_block_reference(x, params)

    assert out.shape == (N, C + num_conv * num_channels, H, W), out.shape
    max_err = float(jnp.max(jnp.abs(out - ref)))
    # bf16 matmul inputs with f32 accumulation -> slightly looser tolerance.
    assert jnp.allclose(out, ref, atol=3e-2, rtol=3e-2), max_err

    print("KERNEL_OK")
</pallas_src>

<mosaic_0001>
module attributes {stable_mosaic.version = 11 : i64} {
  func.func @_bn_stats_kernel(%arg0: i32, %arg1: memref<1x8x256xf32, #tpu.memory_space<vmem>>, %arg2: memref<8x1xf32, #tpu.memory_space<vmem>>, %arg3: memref<8x1xf32, #tpu.memory_space<vmem>>, %arg4: memref<8x1xf32, #tpu.memory_space<vmem>>, %arg5: memref<8x1xf32, #tpu.memory_space<vmem>>, %arg6: memref<8x1xf32, #tpu.memory_space<vmem>>, %arg7: memref<8x1xf32, #tpu.memory_space<vmem>>) attributes {dimension_semantics = [#tpu.dimension_semantics<arbitrary>], iteration_bounds = array<i64: 2>, scalar_prefetch = 0 : i64, scratch_operands = 2 : i64, tpu.core_type = #tpu.core_type<tc>, window_params = [{transform_indices = @transform_0, window_bounds = array<i64: 1, 8, 256>}, {pipeline_mode = #tpu.pipeline_mode<synchronous>, transform_indices = @transform_1, window_bounds = array<i64: 8, 1>}, {pipeline_mode = #tpu.pipeline_mode<synchronous>, transform_indices = @transform_2, window_bounds = array<i64: 8, 1>}, {pipeline_mode = #tpu.pipeline_mode<synchronous>, transform_indices = @transform_3, window_bounds = array<i64: 8, 1>}, {pipeline_mode = #tpu.pipeline_mode<synchronous>, transform_indices = @transform_4, window_bounds = array<i64: 8, 1>}]} {
    %c0_i32 = arith.constant 0 : i32
    %0 = arith.cmpi eq, %arg0, %c0_i32 : i32
    %1 = arith.extui %0 : i1 to i32
    %c0_i32_0 = arith.constant 0 : i32
    %2 = arith.cmpi ne, %1, %c0_i32_0 : i32
    scf.if %2 {
      %cst_13 = arith.constant 0.000000e+00 : f32
      %19 = vector.broadcast %cst_13 : f32 to vector<8x1xf32>
      %c0_14 = arith.constant 0 : index
      %c0_15 = arith.constant 0 : index
      %20 = vector.load %arg6[%c0_14, %c0_15] : memref<8x1xf32, #tpu.memory_space<vmem>>, vector<8x1xf32>
      tpu.vector_store %arg6[%c0_14, %c0_15], %19 {strides = array<i32>} : memref<8x1xf32, #tpu.memory_space<vmem>>, vector<8x1xf32>,
      %cst_16 = arith.constant 0.000000e+00 : f32
      %21 = vector.broadcast %cst_16 : f32 to vector<8x1xf32>
      %c0_17 = arith.constant 0 : index
      %c0_18 = arith.constant 0 : index
      %22 = vector.load %arg7[%c0_17, %c0_18] : memref<8x1xf32, #tpu.memory_space<vmem>>, vector<8x1xf32>
      tpu.vector_store %arg7[%c0_17, %c0_18], %21 {strides = array<i32>} : memref<8x1xf32, #tpu.memory_space<vmem>>, vector<8x1xf32>,
    } else {
    }
    %c0 = arith.constant 0 : index
    %c0_1 = arith.constant 0 : index
    %c0_2 = arith.constant 0 : index
    %3 = vector.load %arg1[%c0, %c0_1, %c0_2] : memref<1x8x256xf32, #tpu.memory_space<vmem>>, vector<1x8x256xf32>
    %4 = vector.shape_cast %3 : vector<1x8x256xf32> to vector<8x256xf32>
    %c0_3 = arith.constant 0 : index
    %c0_4 = arith.constant 0 : index
    %5 = vector.load %arg6[%c0_3, %c0_4] : memref<8x1xf32, #tpu.memory_space<vmem>>, vector<8x1xf32>
    %cst = arith.constant dense<0.000000e+00> : vector<8xf32>
    %6 = vector.multi_reduction <add>, %4, %cst [1] : vector<8x256xf32> to vector<8xf32>
    %7 = vector.shape_cast %6 : vector<8xf32> to vector<8x1xf32>
    %8 = arith.addf %5, %7 : vector<8x1xf32>
    %c0_5 = arith.constant 0 : index
    %c0_6 = arith.constant 0 : index
    %9 = vector.load %arg6[%c0_5, %c0_6] : memref<8x1xf32, #tpu.memory_space<vmem>>, vector<8x1xf32>
    tpu.vector_store %arg6[%c0_5, %c0_6], %8 {strides = array<i32>} : memref<8x1xf32, #tpu.memory_space<vmem>>, vector<8x1xf32>,
    %c0_7 = arith.constant 0 : index
    %c0_8 = arith.constant 0 : index
    %10 = vector.load %arg7[%c0_7, %c0_8] : memref<8x1xf32, #tpu.memory_space<vmem>>, vector<8x1xf32>
    %11 = arith.mulf %4, %4 : vector<8x256xf32>
    %cst_9 = arith.constant dense<0.000000e+00> : vector<8xf32>
    %12 = vector.multi_reduction <add>, %11, %cst_9 [1] : vector<8x256xf32> to vector<8xf32>
    %13 = vector.shape_cast %12 : vector<8xf32> to vector<8x1xf32>
    %14 = arith.addf %10, %13 : vector<8x1xf32>
    %c0_10 = arith.constant 0 : index
    %c0_11 = arith.constant 0 : index
    %15 = vector.load %arg7[%c0_10, %c0_11] : memref<8x1xf32, #tpu.memory_space<vmem>>, vector<8x1xf32>
    tpu.vector_store %arg7[%c0_10, %c0_11], %14 {strides = array<i32>} : memref<8x1xf32, #tpu.memory_space<vmem>>, vector<8x1xf32>,
    %c1_i32 = arith.constant 1 : i32
    %16 = arith.cmpi eq, %arg0, %c1_i32 : i32
    %17 = arith.extui %16 : i1 to i32
    %c0_i32_12 = arith.constant 0 : i32
    %18 = arith.cmpi ne, %17, %c0_i32_12 : i32
    scf.if %18 {
      %c0_13 = arith.constant 0 : index
      %c0_14 = arith.constant 0 : index
      %19 = vector.load %arg6[%c0_13, %c0_14] : memref<8x1xf32, #tpu.memory_space<vmem>>, vector<8x1xf32>
      %cst_15 = arith.constant 0.001953125 : f32
      %20 = vector.broadcast %cst_15 : f32 to vector<8x1xf32>
      %21 = arith.mulf %19, %20 : vector<8x1xf32>
      %c0_16 = arith.constant 0 : index
      %c0_17 = arith.constant 0 : index
      %22 = vector.load %arg7[%c0_16, %c0_17] : memref<8x1xf32, #tpu.memory_space<vmem>>, vector<8x1xf32>
      %cst_18 = arith.constant 0.001953125 : f32
      %23 = vector.broadcast %cst_18 : f32 to vector<8x1xf32>
      %24 = arith.mulf %22, %23 : vector<8x1xf32>
      %25 = arith.mulf %21, %21 : vector<8x1xf32>
      %26 = arith.subf %24, %25 : vector<8x1xf32>
      %c0_19 = arith.constant 0 : index
      %c0_20 = arith.constant 0 : index
      %27 = vector.load %arg2[%c0_19, %c0_20] : memref<8x1xf32, #tpu.memory_space<vmem>>, vector<8x1xf32>
      %cst_21 = arith.constant 9.99999974E-6 : f32
      %28 = vector.broadcast %cst_21 : f32 to vector<8x1xf32>
      %29 = arith.addf %26, %28 : vector<8x1xf32>
      %30 = math.rsqrt %29 : vector<8x1xf32>
      %31 = arith.mulf %27, %30 : vector<8x1xf32>
      %c0_22 = arith.constant 0 : index
      %c0_23 = arith.constant 0 : index
      %32 = vector.load %arg4[%c0_22, %c0_23] : memref<8x1xf32, #tpu.memory_space<vmem>>, vector<8x1xf32>
      tpu.vector_store %arg4[%c0_22, %c0_23], %31 {strides = array<i32>} : memref<8x1xf32, #tpu.memory_space<vmem>>, vector<8x1xf32>,
      %c0_24 = arith.constant 0 : index
      %c0_25 = arith.constant 0 : index
      %33 = vector.load %arg3[%c0_24, %c0_25] : memref<8x1xf32, #tpu.memory_space<vmem>>, vector<8x1xf32>
      %34 = arith.mulf %21, %31 : vector<8x1xf32>
      %35 = arith.subf %33, %34 : vector<8x1xf32>
      %c0_26 = arith.constant 0 : index
      %c0_27 = arith.constant 0 : index
      %36 = vector.load %arg5[%c0_26, %c0_27] : memref<8x1xf32, #tpu.memory_space<vmem>>, vector<8x1xf32>
      tpu.vector_store %arg5[%c0_26, %c0_27], %35 {strides = array<i32>} : memref<8x1xf32, #tpu.memory_space<vmem>>, vector<8x1xf32>,
    } else {
    }
    return
  }
  func.func @transform_0(%arg0: i32) -> (i32, i32, i32) {
    %c0_i32 = arith.constant 0 : i32
    %c0_i32_0 = arith.constant 0 : i32
    %c0_i32_1 = arith.constant 0 : i32
    return %arg0, %c0_i32, %c0_i32_0 : i32, i32, i32
  }
  func.func @transform_1(%arg0: i32) -> (i32, i32) {
    %c0_i32 = arith.constant 0 : i32
    %c0_i32_0 = arith.constant 0 : i32
    %c0_i32_1 = arith.constant 0 : i32
    return %c0_i32, %c0_i32_0 : i32, i32
  }
  func.func @transform_2(%arg0: i32) -> (i32, i32) {
    %c0_i32 = arith.constant 0 : i32
    %c0_i32_0 = arith.constant 0 : i32
    %c0_i32_1 = arith.constant 0 : i32
    return %c0_i32, %c0_i32_0 : i32, i32
  }
  func.func @transform_3(%arg0: i32) -> (i32, i32) {
    %c0_i32 = arith.constant 0 : i32
    %c0_i32_0 = arith.constant 0 : i32
    %c0_i32_1 = arith.constant 0 : i32
    return %c0_i32, %c0_i32_0 : i32, i32
  }
  func.func @transform_4(%arg0: i32) -> (i32, i32) {
    %c0_i32 = arith.constant 0 : i32
    %c0_i32_0 = arith.constant 0 : i32
    %c0_i32_1 = arith.constant 0 : i32
    return %c0_i32, %c0_i32_0 : i32, i32
  }
}

</mosaic_0001>

<bundles_post_ra>
// kernel: tpu_custom_call.1
= control target key start
LH: loop header
LB: loop body
LE: loop exit
PB: predicated region body
PF: predicated region fallthrough
CT: control target
= control target key end

     0   :  { %10 = vsyncpa [#allocation5], 0  ;;  %s555_s0 = inlined_call_operand.hbm [shape: f32[2,8,256], index: 0, kind: input, shape index: {}]   ;;  %s556_s1 = inlined_call_operand.vmem [shape: f32[8,1], index: 1, kind: input, shape index: {}]   ;;  %s557_s2 = inlined_call_operand.vmem [shape: f32[8,1], index: 2, kind: input, shape index: {}]   ;;  %s558_s3 = inlined_call_operand.vmem [shape: f32[8,1], index: 3, kind: output, shape index: {0}]   ;;  %s559_s4 = inlined_call_operand.vmem [shape: f32[8,1], index: 4, kind: output, shape index: {1}]  }
   0x1   :  { %12 = vsyncpa [#allocation5 + $0x1], 0  ;;  %s435_s15 = smov 0   ;;  %s437_s16 = smov 0  }
   0x2   :  { %s439_s17 = smov 0   ;;  %s441_s18 = smov 0  }
   0x3 LB: > { %s454_s19 = sadd.s32 4294967295, %s406_s18   ;;  %s457_s20 = sadd.s32 1, %s406_s18   ;;  %s406_s18 = sphi %s441_s18, %s567_s18   ;;  %s402_s17 = sphi %s439_s17, %s566_s17   ;;  %s398_s16 = sphi %s437_s16, %s565_s16   ;;  %s394_s15 = sphi %s435_s15, %s564_s15  }
   0x4   : > { %s22_s21 = ssub.s32 %s406_s18, %s457_s20  ;;  %s25_s22 = sadd.s32 1, %s402_s17 }
   0x5   : > { %p23_p0 = scmp.eq.s32.totalorder %s22_s21, 0  ;;  %p32_p1 = scmp.ne.s32.totalorder %s402_s17, %s398_s16 }
   0x6   : > { %p33_p2 = scmp.eq.s32.totalorder %s406_s18, 0  ;;  %p38_p3 = scmp.ne.s32.totalorder %s398_s16, %s394_s15 }
   0x7   : > { %s467_s23 = scalar_select %p23_p0, %s402_s17, %s25_s22  }
   0x8   : > { %p34_p4 = por %p33_p2, %p32_p1  ;;  %p39_p5 = scmp.eq.s32.totalorder %s454_s19, 0 }
   0x9   : > { %p306_p6 = scmp.lt.s32.totalorder %s406_s18, 2  ;;  %s152_s25 = sand.u32 1, %s402_s17  }
   0xa   : > { %p471_p7 = por %p39_p5, %p38_p3  ;;  %s290_s26 = sshll.u32 %s152_s25, 4 }
   0xb   : > { %s299_s27 = sshll.u32 %s406_s18, 8  ;;  %s156_s5 = scalar_lea.vmem [#allocation4], %s290_s26 }
   0xc   : > { %s480_s30 = scalar_lea.hbm %s555_s0, %s299_s27  ;;  %s164_s6 = sshll.u32 %s156_s5, 4  ;;  %s482_s6 = int_to_ptr.vmem [resolvable:$true] %s164_s6 }
   0xd   : > { %p484_p8 = pnand %p306_p6, %p34_p4  ;;  %s153_s8 = scalar_lea.sflag [#allocation5], %s152_s25 }
   0xe   : > { %s342_s9 = scalar_lea.hbm %s480_s30, 256  ;;  %s347_s12 = scalar_lea.hbm %s555_s0, 512 }
   0xf   : > { %p343_p11 = scmp.ne.s32.totalorder %s480_s30, %s342_s9  ;;  %p344_p12 = pneg %p484_p8 }
  0x10   : > { %p348_p1 = scmp.lt.u32.totalorder %s480_s30, %s555_s0  ;;  %p349_p2 = scmp.lt.u32.totalorder %s347_s12, %s342_s9 }
  0x11   : > { %p345_p13 = pnand %p344_p12, %p343_p11  ;;  %p351_p4 = scmp.lt.u32.totalorder %s342_s9, %s480_s30 }
  0x12   : > { %p350_p3 = por %p349_p2, %p348_p1 }
  0x13   : > { %p346_p0 = pneg %p345_p13 }
  0x14   : > { %p352_p5 = por %p351_p4, %p350_p3 }
  0x16   : > { %p353_p6 = pnand %p352_p5, %p346_p0 }
  0x18   : > { %356 = shalt.err (!%p353_p6)
}
  0x19   : > { %s357_s15 = scalar_lea.vmem %s482_s6, 256  ;;  %s408_s21 = smov [#allocation4]  }
  0x1a   : > { %p358_p11 = scmp.ne.s32.totalorder %s482_s6, %s357_s15  ;;  %s362_s22 = sshll.u32 %s408_s21, 4  ;;  %s363_s22 = int_to_ptr.vmem [resolvable:$false] %s362_s22 }
  0x1b   : > { %s364_s25 = scalar_lea.vmem %s363_s22, 512  ;;  %p365_p10 = scmp.lt.s32.totalorder %s482_s6, %s363_s22 }
  0x1c   : > { %p360_p13 = pnand %p358_p11, %p344_p12  ;;  %p366_p1 = scmp.lt.s32.totalorder %s364_s25, %s357_s15 }
  0x1e   : > { %p361_p9 = pneg %p360_p13  ;;  %p367_p2 = por %p366_p1, %p365_p10 }
  0x20   : > { %p368_p3 = pnand %p367_p2, %p361_p9 }
  0x22   : > { %371 = shalt.err (!%p368_p3)
}
  0x23   : > { %305 = dma.hbm_to_vmem [thread:$0]  (!%p484_p8), %s480_s30, 256, %s482_s6, %s153_s8  }
  0x24   : > { %p562_p0 = scmp.lt.s32.totalorder %s406_s18, 3  ;;  %p563_p4 = scmp.ge.s32.totalorder %s406_s18, 1 }
  0x26   : > { %p170_p12 = pnand %p563_p4, %p562_p0 }
  0x27   : > { %s175_s26 = sand.u32 (!%p170_p12), 1, %s398_s16  }
  0x28   : > { %173 = sbr.rel (%p170_p12) target bundleno = 240 (0xf0), region = 32  ;;  %s294_s27 = sshll.u32 (!%p170_p12), %s175_s26, 4 }
  0x29   : > { %s176_s28 = scalar_lea.sflag (!%p170_p12), [#allocation5], %s175_s26  ;;  %s179_s29 = scalar_lea.vmem (!%p170_p12), [#allocation4], %s294_s27 }
  0x2f   : > { %389 = dma.done.wait (%p471_p7), %s176_s28, 256  }
  0x30   : > { %391 = vsyncadd (%p471_p7), %s176_s28, 4294967040  ;;  %p295_p9 = scmp.ne.s32.totalorder %s454_s19, 0 }
  0x31   : > { %vm203_vm0 = vcmask (!%p295_p9), 7168   ;;  %v409_v0 = vmov (!%p295_p9), 0.0  }
  0x32   : > { %202 = sbr.rel (%p295_p9) target bundleno = 57 (0x39), region = 40  ;;  %204 = vst.msk [vmem:[#allocation2] sm:$0xff] (!%p295_p9), %vm203_vm0, %v409_v0  ;;  %205 = vst.msk [vmem:[#allocation3] sm:$0xff] (!%p295_p9), %vm203_vm0, %v409_v0 }
  0x39 PF: > { %v206_v1 = vld [vmem:[%s179_s29] sm:$0xff]  ;;  %v207_v2 = vld [vmem:[%s179_s29 + $0x8] sm:$0xff]  ;;  %vm213_vm1 = vcmask 7168   ;;  %p296_p7 = scmp.ne.s32.totalorder %s454_s19, 1 }
  0x3a   : > { %v209_v3 = vadd.f32 %v207_v2, %v206_v1  ;;  %v216_v4 = vmul.f32 %v206_v1, %v206_v1  ;;  %v217_v5 = vmul.f32 %v207_v2, %v207_v2  ;;  %v208_v7 = vld [vmem:[#allocation2] sm:$0xff]  ;;  %v215_v10 = vld [vmem:[#allocation3] sm:$0xff] }
  0x3b   : > { %v233_v20 = vld [vmem:[%s556_s1] sm:$0xff] (!%p296_p7) }
  0x3c   : > { %210 = vadd.xlane.f32.xlu0 %v209_v3  ;;  %v218_v6 = vadd.f32 %v217_v5, %v216_v4  ;;  %v238_v23 = vld [vmem:[%s557_s2] sm:$0xff] (!%p296_p7) }
  0x40   : > { %219 = vadd.xlane.f32.xlu0 %v218_v6 }
  0xc9   : > { %v211_v8 = vpop.xlane.xlu0 %210 }
  0xca   : > { %v212_v9 = vadd.f32 %v211_v8, %v208_v7  ;;  %226 = sbr.rel (%p296_p7) target bundleno = 240 (0xf0), region = 44 }
  0xcc   : > { %214 = vst.msk [vmem:[#allocation2] sm:$0xff] %vm213_vm1, %v212_v9 }
  0xcd   : > { %v220_v11 = vpop.xlane.xlu0 %219 }
  0xce   : > { %v221_v12 = vadd.f32 %v220_v11, %v215_v10 }
  0xd0   : > { %222 = vst.msk [vmem:[#allocation3] sm:$0xff] %vm213_vm1, %v221_v12 }
  0xd3   : > { %v227_v13 = vld [vmem:[#allocation2] sm:$0xff] }
  0xd4   : > { %v228_v15 = vmul.f32 0.001953125, %v227_v13 }
  0xd6   : > { %v231_v17 = vmul.f32 %v228_v15, %v228_v15 }
  0xd7   : > { %v229_v14 = vld [vmem:[#allocation3] sm:$0xff] }
  0xd8   : > { %v230_v16 = vmul.f32 0.001953125, %v229_v14 }
  0xda   : > { %v232_v18 = vsub.f32 %v230_v16, %v231_v17 }
  0xdc   : > { %v234_v19 = vadd.f32 1e-05, %v232_v18 }
  0xde   : > { %340 = vrsqrt.f32 %v234_v19 }
  0xe8   : > { %v341_v21 = vpop.eup %340 }
  0xe9   : > { %v236_v22 = vmul.f32 %v341_v21, %v233_v20 }
  0xeb   : > { %237 = vst.msk [vmem:[%s558_s3] sm:$0xff] %vm213_vm1, %v236_v22  ;;  %v239_v24 = vmul.f32 %v236_v22, %v228_v15 }
  0xed   : > { %v240_v25 = vsub.f32 %v238_v23, %v239_v24 }
  0xef   : > { %241 = vst.msk [vmem:[%s559_s4] sm:$0xff] %vm213_vm1, %v240_v25 }
  0xf0 PF: > { %p15_p8 = scmp.ge.s32.totalorder %s457_s20, 4   ;;  %s564_s15 = smov %s398_s16 }
  0xf1   : > { %s565_s16 = smov %s402_s17  ;;  %s566_s17 = smov %s467_s23 }
  0xf2   : > { %s567_s18 = smov %s457_s20  ;;  %17 = sbr.rel (!%p15_p8) target bundleno = 3 (0x3), region = 84 }
  0xf9   :  { %259 = vsyncpa [#allocation5], 1 }
  0xfa   :  { %261 = vsyncpa [#allocation5 + $0x1], 1 }

</bundles_post_ra>
